<compile_context>
chip_gen: v6e
topology: v6e:2x2x1
jax: 0.10.0
libtpu: 0.0.40
codegen_flags: <defaults>
</compile_context>

<pallas_src>
import functools

import jax
import jax.numpy as jnp
from jax import lax
from jax.experimental import pallas as pl
from jax.experimental.pallas import tpu as pltpu

EPS2 = (1e-6) ** 2              # charbonnier epsilon^2

_LANES = (512, 256, 128)        # lane-dense slab widths (multiples of 128)
_MAX_TILE_ROWS = 1024           # multiple of 32 -> packed-dtype-safe sublane count
_VMEM_BUDGET = 26 * 1024 * 1024 # keep double-buffered inputs + accumulators under this
_VMEM_LIMIT = 32 * 1024 * 1024  # scoped VMEM limit (safe on v5e/v6e/v7x)


# ------------------------------ tiling plan ---------------------------------
def _plan_levels(level_arrays):
    """Per-level (lane, rows, block_rows, padding, raggedness) plan + VMEM budget."""
    plans = []
    for arrs in level_arrays:
        n = arrs[0].size
        itemsum = sum(int(jnp.dtype(a.dtype).itemsize) for a in arrs)
        lane = next((w for w in _LANES if n % w == 0), _LANES[-1])
        rows = -(-n // lane)                    # ceil
        pad = rows * lane - n                   # >0 only when n % 128 != 0 (rare)
        brows = rows if rows <= _MAX_TILE_ROWS else _MAX_TILE_ROWS
        plans.append(dict(n=n, lane=lane, rows=rows, pad=pad, brows=brows,
                          itemsum=itemsum))

    def vmem_bytes():
        tot = 0
        for p in plans:
            tot += 2 * p['brows'] * p['lane'] * p['itemsum']   # double-buffered inputs
            tot += p['brows'] * p['lane'] * 4                  # per-level f32 accumulator
        return tot

    # Shrink the biggest block until the plan fits the VMEM budget.
    while vmem_bytes() > _VMEM_BUDGET:
        p = max(plans, key=lambda q: q['brows'] * q['lane'] * q['itemsum'])
        if p['brows'] <= 32:
            break
        new = max(32, ((p['brows'] // 2 + 31) // 32) * 32)
        if new >= p['brows']:
            new = max(32, p['brows'] - 32)
        p['brows'] = new

    for p in plans:
        p['nblk'] = -(-p['rows'] // p['brows'])
        # ragged: the last block covers garbage rows and/or padded elements.
        p['ragged'] = (p['nblk'] * p['brows'] * p['lane']) != p['n']
    return plans


def _assign_chunks(plans, n_chunks):
    """Split each level's blocks between (up to) 2 chunks; chunk 0 owns the first
    c0 blocks, chunk 1 the rest.  Bigger half goes to the currently lighter chunk."""
    steps = [0, 0]
    for p in plans:
        nb = p['nblk']
        if n_chunks == 1:
            big, small = nb, 0
        else:
            big, small = -(-nb // 2), nb // 2
        if n_chunks == 2 and steps[0] > steps[1]:
            c0, c1 = small, big
        else:
            c0, c1 = big, small
        p['c0'], p['c1'] = c0, c1
        p['s0'], p['s1'] = steps[0], steps[1]
        steps[0] += c0
        steps[1] += c1
    return max(steps[0], steps[1], 1)


def _make_index_map(p):
    """index_map(c, k) for one level's inputs: clamp to the level's step range so
    each block is DMA'd exactly once and the index never changes outside it."""
    s0, s1, c0, c1, nblk = p['s0'], p['s1'], p['c0'], p['c1'], p['nblk']

    def idx(c, k):
        start = s0 + c * (s1 - s0)
        cnt = c0 + c * (c1 - c0)
        off = jnp.minimum(c * c0, nblk - 1)
        blk = jnp.clip(k - start, 0, jnp.maximum(cnt - 1, 0)) + off
        return blk, 0

    return idx


# ----------------------------- Pallas kernel --------------------------------
def _build_kernel(plans, gamma, max_steps):
    L = len(plans)

    def kernel(*refs):
        in_refs = refs[:4 * L]
        out_ref = refs[4 * L]
        accs = refs[4 * L + 1:]
        c = pl.program_id(0)
        k = pl.program_id(1)

        @pl.when(k == 0)                       # per-chunk accumulator reset
        def _():
            for a in accs:
                a[...] = jnp.zeros(a.shape, jnp.float32)

        for l, p in enumerate(plans):
            p0r, t0r, p1r, t1r = in_refs[4 * l:4 * l + 4]
            acc = accs[l]
            start = p['s0'] + c * (p['s1'] - p['s0'])
            cnt = p['c0'] + c * (p['c1'] - p['c0'])
            active = jnp.logical_and(k >= start, k < start + cnt)
            inv = 1.0 / (2.0 ** l)

            def body(masked, p=p, p0r=p0r, t0r=t0r, p1r=p1r, t1r=t1r,
                     acc=acc, inv=inv):
                t0 = t0r[...].astype(jnp.float32)
                t1 = t1r[...].astype(jnp.float32)
                if inv != 1.0:                 # fold the /2**i flow rescale in
                    t0 = t0 * jnp.float32(inv)
                    t1 = t1 * jnp.float32(inv)
                d0 = p0r[...].astype(jnp.float32) - t0
                d1 = p1r[...].astype(jnp.float32) - t1
                v = jnp.sqrt(d0 * d0 + EPS2) + jnp.sqrt(d1 * d1 + EPS2)
                if masked:                     # only traced for the tail block
                    base = (p['nblk'] - 1) * p['brows'] * p['lane']
                    row = lax.broadcasted_iota(jnp.int32, (p['brows'], p['lane']), 0)
                    col = lax.broadcasted_iota(jnp.int32, (p['brows'], p['lane']), 1)
                    flat = base + row * p['lane'] + col
                    v = jnp.where(flat < p['n'], v, 0.0)
                acc[...] += v                  # pure VPU/EUP steady state

            if p['ragged']:
                blk = (k - start) + c * p['c0']
                is_tail = jnp.logical_and(active, blk == p['nblk'] - 1)

                @pl.when(jnp.logical_and(active, jnp.logical_not(is_tail)))
                def _(body=body):
                    body(False)

                @pl.when(is_tail)              # mask only the level's last block
                def _(body=body):
                    body(True)
            else:
                @pl.when(active)
                def _(body=body):
                    body(False)

        @pl.when(k == max_steps - 1)           # deferred XLU reduce + gamma^i/n weighting
        def _():
            total = jnp.float32(0.0)
            for l, p in enumerate(plans):
                w = jnp.float32((gamma ** l) / p['n'])
                total = total + jnp.sum(accs[l][...]) * w
            out_ref[...] = jnp.broadcast_to(total, out_ref.shape)

    return kernel


# ------------------------------ JAX glue -------------------------------------
def _bilinear_down_pow2(x, s):
    """Exact match of F.interpolate(x, scale_factor=1/s, mode='bilinear',
    align_corners=False) for power-of-two s dividing H and W (0.5/0.5 blend)."""
    if s == 1:
        return x
    a = s // 2 - 1
    h = x.shape[2] // s
    w = x.shape[3] // s
    r = 0.5 * (x[:, :, a::s, :][:, :, :h, :] + x[:, :, a + 1::s, :][:, :, :h, :])
    return 0.5 * (r[:, :, :, a::s][:, :, :, :w] + r[:, :, :, a + 1::s][:, :, :, :w])


def flow_teacher_loss(flowt0_pred_tea_list, flowt1_pred_tea_list,
                      flowt0, flowt1, *, weight, gamma):
    """Pallas implementation of FlowTeacherLoss.forward.  Returns shape (1,) f32."""
    L = len(flowt0_pred_tea_list)
    if L == 0:
        return jnp.zeros((1,), jnp.float32)

    # Teacher-flow pyramid targets (the /2**i rescale is folded into the kernel).
    # TODO(synk): fuse the level>=1 strided 0.5/0.5 downsample into the kernel.
    level_arrays = []
    for i in range(L):
        s = 2 ** i
        level_arrays.append((flowt0_pred_tea_list[i],
                             _bilinear_down_pow2(flowt0, s),
                             flowt1_pred_tea_list[i],
                             _bilinear_down_pow2(flowt1, s)))
        for a in level_arrays[-1]:
            assert a.shape == level_arrays[-1][0].shape

    plans = _plan_levels(level_arrays)
    total_blocks = sum(p['nblk'] for p in plans)
    n_chunks = 2 if total_blocks >= 2 else 1      # balanced split -> both v7x TCs busy
    max_steps = _assign_chunks(plans, n_chunks)

    flat_inputs, in_specs = [], []
    for arrs, p in zip(level_arrays, plans):
        idx = _make_index_map(p)
        for a in arrs:
            fa = a.reshape(-1)                    # contiguous reshape, no copy
            if p['pad']:
                # TODO(synk): only hit when n % 128 != 0 (tiny/odd levels);
                # materializes a small padded copy, masked exactly in-kernel.
                fa = jnp.pad(fa, (0, p['pad']))
            flat_inputs.append(fa.reshape(p['rows'], p['lane']))
            in_specs.append(pl.BlockSpec((p['brows'], p['lane']), idx))

    kernel = _build_kernel(plans, gamma, max_steps)

    partials = pl.pallas_call(
        kernel,
        out_shape=jax.ShapeDtypeStruct((n_chunks, 8, 128), jnp.float32),
        grid_spec=pltpu.PrefetchScalarGridSpec(
            num_scalar_prefetch=0,
            grid=(n_chunks, max_steps),
            in_specs=in_specs,
            out_specs=pl.BlockSpec((1, 8, 128), lambda c, k: (c, 0, 0)),
            scratch_shapes=[pltpu.VMEM((p['brows'], p['lane']), jnp.float32)
                            for p in plans]),
        compiler_params=pltpu.CompilerParams(
            # chunk axis "parallel": each TensorCore gets private VMEM scratch;
            # per-chunk reset at k==0 keeps single-core sequential runs correct.
            dimension_semantics=("parallel", "arbitrary"),
            vmem_limit_bytes=_VMEM_LIMIT),
    )(*flat_inputs)

    loss = partials[:, 0, 0].sum() * jnp.float32(weight)
    return jnp.reshape(loss, (1,))


# --------------------------- pure-JAX reference -------------------------------
def _flow_teacher_loss_ref(p0_list, p1_list, flowt0, flowt1, *, weight, gamma):
    def charb_mean(d):
        return jnp.mean(jnp.sqrt(d * d + EPS2))

    loss = jnp.zeros((1,), dtype=jnp.float32)
    for i in range(len(p0_list)):
        s = 2 ** i
        f0d = _bilinear_down_pow2(flowt0, s) / s
        f1d = _bilinear_down_pow2(flowt1, s) / s
        loss = loss + charb_mean(p0_list[i] - f0d) * (gamma ** i)
        loss = loss + charb_mean(p1_list[i] - f1d) * (gamma ** i)
    return loss * weight


# --------------------------------- main ---------------------------------------
if __name__ == "__main__":
    WEIGHT = 1.0
    GAMMA = 0.8

    fn = jax.jit(functools.partial(flow_teacher_loss, weight=WEIGHT, gamma=GAMMA))

    def make_inputs(seed, N, C, H, W, levels):
        keys = jax.random.split(jax.random.PRNGKey(seed), 2 + 2 * levels)
        flowt0 = jax.random.normal(keys[0], (N, C, H, W), jnp.float32)
        flowt1 = jax.random.normal(keys[1], (N, C, H, W), jnp.float32)
        p0 = [jax.random.normal(keys[2 + i],
                                (N, C, H // 2 ** i, W // 2 ** i), jnp.float32)
              for i in range(levels)]
        p1 = [jax.random.normal(keys[2 + levels + i],
                                (N, C, H // 2 ** i, W // 2 ** i), jnp.float32)
              for i in range(levels)]
        return p0, p1, flowt0, flowt1

    # Case 1: small shapes (single block per level; exercises the padded tiny level).
    p0, p1, f0, f1 = make_inputs(0, 2, 2, 16, 16, 3)
    out = jax.block_until_ready(fn(p0, p1, f0, f1))
    ref = _flow_teacher_loss_ref(p0, p1, f0, f1, weight=WEIGHT, gamma=GAMMA)
    assert out.shape == (1,) and out.dtype == jnp.float32
    assert jnp.allclose(out, ref, rtol=1e-5, atol=1e-5), (out, ref)

    # Case 2: medium shapes (multi-block level 0 with ragged tail + balanced
    # 2-chunk split with real work in both chunks).
    p0, p1, f0, f1 = make_inputs(1, 2, 2, 272, 256, 3)
    out = jax.block_until_ready(fn(p0, p1, f0, f1))
    ref = _flow_teacher_loss_ref(p0, p1, f0, f1, weight=WEIGHT, gamma=GAMMA)
    assert out.shape == (1,) and out.dtype == jnp.float32
    assert jnp.allclose(out, ref, rtol=1e-4, atol=1e-4), (out, ref)

    print("KERNEL_OK")
</pallas_src>

<mosaic_0001>
module attributes {stable_mosaic.version = 11 : i64} {
  func.func @kernel(%arg0: i32, %arg1: i32, %arg2: memref<2x512xf32, #tpu.memory_space<vmem>>, %arg3: memref<2x512xf32, #tpu.memory_space<vmem>>, %arg4: memref<2x512xf32, #tpu.memory_space<vmem>>, %arg5: memref<2x512xf32, #tpu.memory_space<vmem>>, %arg6: memref<1x256xf32, #tpu.memory_space<vmem>>, %arg7: memref<1x256xf32, #tpu.memory_space<vmem>>, %arg8: memref<1x256xf32, #tpu.memory_space<vmem>>, %arg9: memref<1x256xf32, #tpu.memory_space<vmem>>, %arg10: memref<1x128xf32, #tpu.memory_space<vmem>>, %arg11: memref<1x128xf32, #tpu.memory_space<vmem>>, %arg12: memref<1x128xf32, #tpu.memory_space<vmem>>, %arg13: memref<1x128xf32, #tpu.memory_space<vmem>>, %arg14: memref<1x8x128xf32, #tpu.memory_space<vmem>>, %arg15: memref<2x512xf32, #tpu.memory_space<vmem>>, %arg16: memref<1x256xf32, #tpu.memory_space<vmem>>, %arg17: memref<1x128xf32, #tpu.memory_space<vmem>>) attributes {dimension_semantics = [#tpu.dimension_semantics<parallel>, #tpu.dimension_semantics<arbitrary>], iteration_bounds = array<i64: 2, 2>, scalar_prefetch = 0 : i64, scratch_operands = 3 : i64, tpu.core_type = #tpu.core_type<tc>, window_params = [{transform_indices = @transform_0, window_bounds = array<i64: 2, 512>}, {transform_indices = @transform_1, window_bounds = array<i64: 2, 512>}, {transform_indices = @transform_2, window_bounds = array<i64: 2, 512>}, {transform_indices = @transform_3, window_bounds = array<i64: 2, 512>}, {transform_indices = @transform_4, window_bounds = array<i64: 1, 256>}, {transform_indices = @transform_5, window_bounds = array<i64: 1, 256>}, {transform_indices = @transform_6, window_bounds = array<i64: 1, 256>}, {transform_indices = @transform_7, window_bounds = array<i64: 1, 256>}, {transform_indices = @transform_8, window_bounds = array<i64: 1, 128>}, {transform_indices = @transform_9, window_bounds = array<i64: 1, 128>}, {transform_indices = @transform_10, window_bounds = array<i64: 1, 128>}, {transform_indices = @transform_11, window_bounds = array<i64: 1, 128>}, {transform_indices = @transform_12, window_bounds = array<i64: 1, 8, 128>}]} {
    %c0_i32 = arith.constant 0 : i32
    %0 = arith.cmpi eq, %arg1, %c0_i32 : i32
    %1 = arith.extui %0 : i1 to i32
    %c0_i32_0 = arith.constant 0 : i32
    %2 = arith.cmpi ne, %1, %c0_i32_0 : i32
    scf.if %2 {
      %cst = arith.constant 0.000000e+00 : f32
      %45 = vector.broadcast %cst : f32 to vector<2x512xf32>
      %c0 = arith.constant 0 : index
      %c0_19 = arith.constant 0 : index
      %46 = vector.load %arg15[%c0, %c0_19] : memref<2x512xf32, #tpu.memory_space<vmem>>, vector<2x512xf32>
      tpu.vector_store %arg15[%c0, %c0_19], %45 {strides = array<i32>} : memref<2x512xf32, #tpu.memory_space<vmem>>, vector<2x512xf32>,
      %cst_20 = arith.constant 0.000000e+00 : f32
      %47 = vector.broadcast %cst_20 : f32 to vector<1x256xf32>
      %c0_21 = arith.constant 0 : index
      %c0_22 = arith.constant 0 : index
      %48 = vector.load %arg16[%c0_21, %c0_22] : memref<1x256xf32, #tpu.memory_space<vmem>>, vector<1x256xf32>
      tpu.vector_store %arg16[%c0_21, %c0_22], %47 {strides = array<i32>} : memref<1x256xf32, #tpu.memory_space<vmem>>, vector<1x256xf32>,
      %cst_23 = arith.constant 0.000000e+00 : f32
      %49 = vector.broadcast %cst_23 : f32 to vector<1x128xf32>
      %c0_24 = arith.constant 0 : index
      %c0_25 = arith.constant 0 : index
      %50 = vector.load %arg17[%c0_24, %c0_25] : memref<1x128xf32, #tpu.memory_space<vmem>>, vector<1x128xf32>
      tpu.vector_store %arg17[%c0_24, %c0_25], %49 {strides = array<i32>} : memref<1x128xf32, #tpu.memory_space<vmem>>, vector<1x128xf32>,
    } else {
    }
    %c0_i32_1 = arith.constant 0 : i32
    %3 = arith.muli %arg0, %c0_i32_1 : i32
    %c0_i32_2 = arith.constant 0 : i32
    %4 = arith.addi %c0_i32_2, %3 : i32
    %c-1_i32 = arith.constant -1 : i32
    %5 = arith.muli %arg0, %c-1_i32 : i32
    %c1_i32 = arith.constant 1 : i32
    %6 = arith.addi %c1_i32, %5 : i32
    %7 = arith.cmpi sge, %arg1, %4 : i32
    %8 = arith.addi %4, %6 : i32
    %9 = arith.cmpi slt, %arg1, %8 : i32
    %10 = arith.andi %7, %9 : i1
    %11 = arith.extui %10 : i1 to i32
    %c0_i32_3 = arith.constant 0 : i32
    %12 = arith.cmpi ne, %11, %c0_i32_3 : i32
    scf.if %12 {
      %c0 = arith.constant 0 : index
      %c0_19 = arith.constant 0 : index
      %45 = vector.load %arg3[%c0, %c0_19] : memref<2x512xf32, #tpu.memory_space<vmem>>, vector<2x512xf32>
      %c0_20 = arith.constant 0 : index
      %c0_21 = arith.constant 0 : index
      %46 = vector.load %arg5[%c0_20, %c0_21] : memref<2x512xf32, #tpu.memory_space<vmem>>, vector<2x512xf32>
      %c0_22 = arith.constant 0 : index
      %c0_23 = arith.constant 0 : index
      %47 = vector.load %arg2[%c0_22, %c0_23] : memref<2x512xf32, #tpu.memory_space<vmem>>, vector<2x512xf32>
      %48 = arith.subf %47, %45 : vector<2x512xf32>
      %c0_24 = arith.constant 0 : index
      %c0_25 = arith.constant 0 : index
      %49 = vector.load %arg4[%c0_24, %c0_25] : memref<2x512xf32, #tpu.memory_space<vmem>>, vector<2x512xf32>
      %50 = arith.subf %49, %46 : vector<2x512xf32>
      %51 = arith.mulf %48, %48 : vector<2x512xf32>
      %cst = arith.constant 9.99999996E-13 : f32
      %52 = vector.broadcast %cst : f32 to vector<2x512xf32>
      %53 = arith.addf %51, %52 : vector<2x512xf32>
      %54 = math.sqrt %53 : vector<2x512xf32>
      %55 = arith.mulf %50, %50 : vector<2x512xf32>
      %cst_26 = arith.constant 9.99999996E-13 : f32
      %56 = vector.broadcast %cst_26 : f32 to vector<2x512xf32>
      %57 = arith.addf %55, %56 : vector<2x512xf32>
      %58 = math.sqrt %57 : vector<2x512xf32>
      %59 = arith.addf %54, %58 : vector<2x512xf32>
      %c0_27 = arith.constant 0 : index
      %c0_28 = arith.constant 0 : index
      %60 = vector.load %arg15[%c0_27, %c0_28] : memref<2x512xf32, #tpu.memory_space<vmem>>, vector<2x512xf32>
      %61 = arith.addf %60, %59 : vector<2x512xf32>
      %c0_29 = arith.constant 0 : index
      %c0_30 = arith.constant 0 : index
      %62 = vector.load %arg15[%c0_29, %c0_30] : memref<2x512xf32, #tpu.memory_space<vmem>>, vector<2x512xf32>
      tpu.vector_store %arg15[%c0_29, %c0_30], %61 {strides = array<i32>} : memref<2x512xf32, #tpu.memory_space<vmem>>, vector<2x512xf32>,
    } else {
    }
    %c-1_i32_4 = arith.constant -1 : i32
    %13 = arith.muli %arg0, %c-1_i32_4 : i32
    %c1_i32_5 = arith.constant 1 : i32
    %14 = arith.addi %c1_i32_5, %13 : i32
    %c1_i32_6 = arith.constant 1 : i32
    %15 = arith.muli %arg0, %c1_i32_6 : i32
    %c0_i32_7 = arith.constant 0 : i32
    %16 = arith.addi %c0_i32_7, %15 : i32
    %17 = arith.cmpi sge, %arg1, %14 : i32
    %18 = arith.addi %14, %16 : i32
    %19 = arith.cmpi slt, %arg1, %18 : i32
    %20 = arith.andi %17, %19 : i1
    %21 = arith.extui %20 : i1 to i32
    %c0_i32_8 = arith.constant 0 : i32
    %22 = arith.cmpi ne, %21, %c0_i32_8 : i32
    scf.if %22 {
      %c0 = arith.constant 0 : index
      %c0_19 = arith.constant 0 : index
      %45 = vector.load %arg7[%c0, %c0_19] : memref<1x256xf32, #tpu.memory_space<vmem>>, vector<1x256xf32>
      %c0_20 = arith.constant 0 : index
      %c0_21 = arith.constant 0 : index
      %46 = vector.load %arg9[%c0_20, %c0_21] : memref<1x256xf32, #tpu.memory_space<vmem>>, vector<1x256xf32>
      %cst = arith.constant 5.000000e-01 : f32
      %47 = vector.broadcast %cst : f32 to vector<1x256xf32>
      %48 = arith.mulf %45, %47 : vector<1x256xf32>
      %cst_22 = arith.constant 5.000000e-01 : f32
      %49 = vector.broadcast %cst_22 : f32 to vector<1x256xf32>
      %50 = arith.mulf %46, %49 : vector<1x256xf32>
      %c0_23 = arith.constant 0 : index
      %c0_24 = arith.constant 0 : index
      %51 = vector.load %arg6[%c0_23, %c0_24] : memref<1x256xf32, #tpu.memory_space<vmem>>, vector<1x256xf32>
      %52 = arith.subf %51, %48 : vector<1x256xf32>
      %c0_25 = arith.constant 0 : index
      %c0_26 = arith.constant 0 : index
      %53 = vector.load %arg8[%c0_25, %c0_26] : memref<1x256xf32, #tpu.memory_space<vmem>>, vector<1x256xf32>
      %54 = arith.subf %53, %50 : vector<1x256xf32>
      %55 = arith.mulf %52, %52 : vector<1x256xf32>
      %cst_27 = arith.constant 9.99999996E-13 : f32
      %56 = vector.broadcast %cst_27 : f32 to vector<1x256xf32>
      %57 = arith.addf %55, %56 : vector<1x256xf32>
      %58 = math.sqrt %57 : vector<1x256xf32>
      %59 = arith.mulf %54, %54 : vector<1x256xf32>
      %cst_28 = arith.constant 9.99999996E-13 : f32
      %60 = vector.broadcast %cst_28 : f32 to vector<1x256xf32>
      %61 = arith.addf %59, %60 : vector<1x256xf32>
      %62 = math.sqrt %61 : vector<1x256xf32>
      %63 = arith.addf %58, %62 : vector<1x256xf32>
      %c0_29 = arith.constant 0 : index
      %c0_30 = arith.constant 0 : index
      %64 = vector.load %arg16[%c0_29, %c0_30] : memref<1x256xf32, #tpu.memory_space<vmem>>, vector<1x256xf32>
      %65 = arith.addf %64, %63 : vector<1x256xf32>
      %c0_31 = arith.constant 0 : index
      %c0_32 = arith.constant 0 : index
      %66 = vector.load %arg16[%c0_31, %c0_32] : memref<1x256xf32, #tpu.memory_space<vmem>>, vector<1x256xf32>
      tpu.vector_store %arg16[%c0_31, %c0_32], %65 {strides = array<i32>} : memref<1x256xf32, #tpu.memory_space<vmem>>, vector<1x256xf32>,
    } else {
    }
    %c0_i32_9 = arith.constant 0 : i32
    %23 = arith.muli %arg0, %c0_i32_9 : i32
    %c1_i32_10 = arith.constant 1 : i32
    %24 = arith.addi %c1_i32_10, %23 : i32
    %c-1_i32_11 = arith.constant -1 : i32
    %25 = arith.muli %arg0, %c-1_i32_11 : i32
    %c1_i32_12 = arith.constant 1 : i32
    %26 = arith.addi %c1_i32_12, %25 : i32
    %27 = arith.cmpi sge, %arg1, %24 : i32
    %28 = arith.addi %24, %26 : i32
    %29 = arith.cmpi slt, %arg1, %28 : i32
    %30 = arith.andi %27, %29 : i1
    %31 = arith.subi %arg1, %24 : i32
    %c1_i32_13 = arith.constant 1 : i32
    %32 = arith.muli %arg0, %c1_i32_13 : i32
    %33 = arith.addi %31, %32 : i32
    %c0_i32_14 = arith.constant 0 : i32
    %34 = arith.cmpi eq, %33, %c0_i32_14 : i32
    %35 = arith.andi %30, %34 : i1
    %true = arith.constant true
    %36 = arith.xori %35, %true : i1
    %37 = arith.andi %30, %36 : i1
    %38 = arith.extui %37 : i1 to i32
    %c0_i32_15 = arith.constant 0 : i32
    %39 = arith.cmpi ne, %38, %c0_i32_15 : i32
    scf.if %39 {
      %c0 = arith.constant 0 : index
      %c0_19 = arith.constant 0 : index
      %45 = vector.load %arg11[%c0, %c0_19] : memref<1x128xf32, #tpu.memory_space<vmem>>, vector<1x128xf32>
      %c0_20 = arith.constant 0 : index
      %c0_21 = arith.constant 0 : index
      %46 = vector.load %arg13[%c0_20, %c0_21] : memref<1x128xf32, #tpu.memory_space<vmem>>, vector<1x128xf32>
      %cst = arith.constant 2.500000e-01 : f32
      %47 = vector.broadcast %cst : f32 to vector<1x128xf32>
      %48 = arith.mulf %45, %47 : vector<1x128xf32>
      %cst_22 = arith.constant 2.500000e-01 : f32
      %49 = vector.broadcast %cst_22 : f32 to vector<1x128xf32>
      %50 = arith.mulf %46, %49 : vector<1x128xf32>
      %c0_23 = arith.constant 0 : index
      %c0_24 = arith.constant 0 : index
      %51 = vector.load %arg10[%c0_23, %c0_24] : memref<1x128xf32, #tpu.memory_space<vmem>>, vector<1x128xf32>
      %52 = arith.subf %51, %48 : vector<1x128xf32>
      %c0_25 = arith.constant 0 : index
      %c0_26 = arith.constant 0 : index
      %53 = vector.load %arg12[%c0_25, %c0_26] : memref<1x128xf32, #tpu.memory_space<vmem>>, vector<1x128xf32>
      %54 = arith.subf %53, %50 : vector<1x128xf32>
      %55 = arith.mulf %52, %52 : vector<1x128xf32>
      %cst_27 = arith.constant 9.99999996E-13 : f32
      %56 = vector.broadcast %cst_27 : f32 to vector<1x128xf32>
      %57 = arith.addf %55, %56 : vector<1x128xf32>
      %58 = math.sqrt %57 : vector<1x128xf32>
      %59 = arith.mulf %54, %54 : vector<1x128xf32>
      %cst_28 = arith.constant 9.99999996E-13 : f32
      %60 = vector.broadcast %cst_28 : f32 to vector<1x128xf32>
      %61 = arith.addf %59, %60 : vector<1x128xf32>
      %62 = math.sqrt %61 : vector<1x128xf32>
      %63 = arith.addf %58, %62 : vector<1x128xf32>
      %c0_29 = arith.constant 0 : index
      %c0_30 = arith.constant 0 : index
      %64 = vector.load %arg17[%c0_29, %c0_30] : memref<1x128xf32, #tpu.memory_space<vmem>>, vector<1x128xf32>
      %65 = arith.addf %64, %63 : vector<1x128xf32>
      %c0_31 = arith.constant 0 : index
      %c0_32 = arith.constant 0 : index
      %66 = vector.load %arg17[%c0_31, %c0_32] : memref<1x128xf32, #tpu.memory_space<vmem>>, vector<1x128xf32>
      tpu.vector_store %arg17[%c0_31, %c0_32], %65 {strides = array<i32>} : memref<1x128xf32, #tpu.memory_space<vmem>>, vector<1x128xf32>,
    } else {
    }
    %40 = arith.extui %35 : i1 to i32
    %c0_i32_16 = arith.constant 0 : i32
    %41 = arith.cmpi ne, %40, %c0_i32_16 : i32
    scf.if %41 {
      %c0 = arith.constant 0 : index
      %c0_19 = arith.constant 0 : index
      %45 = vector.load %arg11[%c0, %c0_19] : memref<1x128xf32, #tpu.memory_space<vmem>>, vector<1x128xf32>
      %c0_20 = arith.constant 0 : index
      %c0_21 = arith.constant 0 : index
      %46 = vector.load %arg13[%c0_20, %c0_21] : memref<1x128xf32, #tpu.memory_space<vmem>>, vector<1x128xf32>
      %cst = arith.constant 2.500000e-01 : f32
      %47 = vector.broadcast %cst : f32 to vector<1x128xf32>
      %48 = arith.mulf %45, %47 : vector<1x128xf32>
      %cst_22 = arith.constant 2.500000e-01 : f32
      %49 = vector.broadcast %cst_22 : f32 to vector<1x128xf32>
      %50 = arith.mulf %46, %49 : vector<1x128xf32>
      %c0_23 = arith.constant 0 : index
      %c0_24 = arith.constant 0 : index
      %51 = vector.load %arg10[%c0_23, %c0_24] : memref<1x128xf32, #tpu.memory_space<vmem>>, vector<1x128xf32>
      %52 = arith.subf %51, %48 : vector<1x128xf32>
      %c0_25 = arith.constant 0 : index
      %c0_26 = arith.constant 0 : index
      %53 = vector.load %arg12[%c0_25, %c0_26] : memref<1x128xf32, #tpu.memory_space<vmem>>, vector<1x128xf32>
      %54 = arith.subf %53, %50 : vector<1x128xf32>
      %55 = arith.mulf %52, %52 : vector<1x128xf32>
      %cst_27 = arith.constant 9.99999996E-13 : f32
      %56 = vector.broadcast %cst_27 : f32 to vector<1x128xf32>
      %57 = arith.addf %55, %56 : vector<1x128xf32>
      %58 = math.sqrt %57 : vector<1x128xf32>
      %59 = arith.mulf %54, %54 : vector<1x128xf32>
      %cst_28 = arith.constant 9.99999996E-13 : f32
      %60 = vector.broadcast %cst_28 : f32 to vector<1x128xf32>
      %61 = arith.addf %59, %60 : vector<1x128xf32>
      %62 = math.sqrt %61 : vector<1x128xf32>
      %63 = arith.addf %58, %62 : vector<1x128xf32>
      %64 = tpu.iota {dimensions = array<i32: 0>} : vector<1x128xi32>
      %65 = tpu.iota {dimensions = array<i32: 1>} : vector<1x128xi32>
      %c128_i32 = arith.constant 128 : i32
      %66 = vector.broadcast %c128_i32 : i32 to vector<1x128xi32>
      %67 = arith.muli %64, %66 : vector<1x128xi32>
      %c0_i32_29 = arith.constant 0 : i32
      %68 = vector.broadcast %c0_i32_29 : i32 to vector<1x128xi32>
      %69 = arith.addi %68, %67 : vector<1x128xi32>
      %70 = arith.addi %69, %65 : vector<1x128xi32>
      %c64_i32 = arith.constant 64 : i32
      %71 = vector.broadcast %c64_i32 : i32 to vector<1x128xi32>
      %72 = arith.cmpi slt, %70, %71 : vector<1x128xi32>
      %cst_30 = arith.constant 0.000000e+00 : f32
      %73 = vector.broadcast %cst_30 : f32 to vector<1x128xf32>
      %74 = arith.select %72, %63, %73 : vector<1x128xi1>, vector<1x128xf32>
      %c0_31 = arith.constant 0 : index
      %c0_32 = arith.constant 0 : index
      %75 = vector.load %arg17[%c0_31, %c0_32] : memref<1x128xf32, #tpu.memory_space<vmem>>, vector<1x128xf32>
      %76 = arith.addf %75, %74 : vector<1x128xf32>
      %c0_33 = arith.constant 0 : index
      %c0_34 = arith.constant 0 : index
      %77 = vector.load %arg17[%c0_33, %c0_34] : memref<1x128xf32, #tpu.memory_space<vmem>>, vector<1x128xf32>
      tpu.vector_store %arg17[%c0_33, %c0_34], %76 {strides = array<i32>} : memref<1x128xf32, #tpu.memory_space<vmem>>, vector<1x128xf32>,
    } else {
    }
    %c1_i32_17 = arith.constant 1 : i32
    %42 = arith.cmpi eq, %arg1, %c1_i32_17 : i32
    %43 = arith.extui %42 : i1 to i32
    %c0_i32_18 = arith.constant 0 : i32
    %44 = arith.cmpi ne, %43, %c0_i32_18 : i32
    scf.if %44 {
      %c0 = arith.constant 0 : index
      %c0_19 = arith.constant 0 : index
      %45 = vector.load %arg15[%c0, %c0_19] : memref<2x512xf32, #tpu.memory_space<vmem>>, vector<2x512xf32>
      %46 = vector.shape_cast %45 : vector<2x512xf32> to vector<1x2x512xf32>
      %cst = arith.constant dense<0.000000e+00> : vector<1xf32>
      %47 = vector.multi_reduction <add>, %46, %cst [1, 2] : vector<1x2x512xf32> to vector<1xf32>
      %48 = vector.shape_cast %47 : vector<1xf32> to vector<1x1x1xf32>
      %49 = vector.extract %48[0, 0, 0] : f32 from vector<1x1x1xf32>
      %cst_20 = arith.constant 9.765625E-4 : f32
      %50 = arith.mulf %49, %cst_20 : f32
      %cst_21 = arith.constant 0.000000e+00 : f32
      %51 = arith.addf %cst_21, %50 : f32
      %c0_22 = arith.constant 0 : index
      %c0_23 = arith.constant 0 : index
      %52 = vector.load %arg16[%c0_22, %c0_23] : memref<1x256xf32, #tpu.memory_space<vmem>>, vector<1x256xf32>
      %53 = vector.shape_cast %52 : vector<1x256xf32> to vector<1x1x256xf32>
      %cst_24 = arith.constant dense<0.000000e+00> : vector<1xf32>
      %54 = vector.multi_reduction <add>, %53, %cst_24 [1, 2] : vector<1x1x256xf32> to vector<1xf32>
      %55 = vector.shape_cast %54 : vector<1xf32> to vector<1x1x1xf32>
      %56 = vector.extract %55[0, 0, 0] : f32 from vector<1x1x1xf32>
      %cst_25 = arith.constant 3.125000e-03 : f32
      %57 = arith.mulf %56, %cst_25 : f32
      %58 = arith.addf %51, %57 : f32
      %c0_26 = arith.constant 0 : index
      %c0_27 = arith.constant 0 : index
      %59 = vector.load %arg17[%c0_26, %c0_27] : memref<1x128xf32, #tpu.memory_space<vmem>>, vector<1x128xf32>
      %60 = vector.shape_cast %59 : vector<1x128xf32> to vector<1x1x128xf32>
      %cst_28 = arith.constant dense<0.000000e+00> : vector<1xf32>
      %61 = vector.multi_reduction <add>, %60, %cst_28 [1, 2] : vector<1x1x128xf32> to vector<1xf32>
      %62 = vector.shape_cast %61 : vector<1xf32> to vector<1x1x1xf32>
      %63 = vector.extract %62[0, 0, 0] : f32 from vector<1x1x1xf32>
      %cst_29 = arith.constant 0.00999999977 : f32
      %64 = arith.mulf %63, %cst_29 : f32
      %65 = arith.addf %58, %64 : f32
      %66 = vector.broadcast %65 : f32 to vector<1x8x128xf32>
      %c0_30 = arith.constant 0 : index
      %c0_31 = arith.constant 0 : index
      %c0_32 = arith.constant 0 : index
      %67 = vector.load %arg14[%c0_30, %c0_31, %c0_32] : memref<1x8x128xf32, #tpu.memory_space<vmem>>, vector<1x8x128xf32>
      tpu.vector_store %arg14[%c0_30, %c0_31, %c0_32], %66 {strides = array<i32>} : memref<1x8x128xf32, #tpu.memory_space<vmem>>, vector<1x8x128xf32>,
    } else {
    }
    return
  }
  func.func @transform_0(%arg0: i32, %arg1: i32) -> (i32, i32) {
    %c0_i32 = arith.constant 0 : i32
    %0 = arith.muli %arg0, %c0_i32 : i32
    %c0_i32_0 = arith.constant 0 : i32
    %1 = arith.addi %c0_i32_0, %0 : i32
    %c-1_i32 = arith.constant -1 : i32
    %2 = arith.muli %arg0, %c-1_i32 : i32
    %c1_i32 = arith.constant 1 : i32
    %3 = arith.addi %c1_i32, %2 : i32
    %c1_i32_1 = arith.constant 1 : i32
    %4 = arith.muli %arg0, %c1_i32_1 : i32
    %c0_i32_2 = arith.constant 0 : i32
    %5 = arith.minsi %4, %c0_i32_2 : i32
    %6 = arith.subi %arg1, %1 : i32
    %c1_i32_3 = arith.constant 1 : i32
    %7 = arith.subi %3, %c1_i32_3 : i32
    %c0_i32_4 = arith.constant 0 : i32
    %8 = arith.maxsi %7, %c0_i32_4 : i32
    %c0_i32_5 = arith.constant 0 : i32
    %9 = arith.maxsi %c0_i32_5, %6 : i32
    %10 = arith.minsi %8, %9 : i32
    %11 = arith.addi %10, %5 : i32
    %c0_i32_6 = arith.constant 0 : i32
    %c0_i32_7 = arith.constant 0 : i32
    return %11, %c0_i32_6 : i32, i32
  }
  func.func @transform_1(%arg0: i32, %arg1: i32) -> (i32, i32) {
    %c0_i32 = arith.constant 0 : i32
    %0 = arith.muli %arg0, %c0_i32 : i32
    %c0_i32_0 = arith.constant 0 : i32
    %1 = arith.addi %c0_i32_0, %0 : i32
    %c-1_i32 = arith.constant -1 : i32
    %2 = arith.muli %arg0, %c-1_i32 : i32
    %c1_i32 = arith.constant 1 : i32
    %3 = arith.addi %c1_i32, %2 : i32
    %c1_i32_1 = arith.constant 1 : i32
    %4 = arith.muli %arg0, %c1_i32_1 : i32
    %c0_i32_2 = arith.constant 0 : i32
    %5 = arith.minsi %4, %c0_i32_2 : i32
    %6 = arith.subi %arg1, %1 : i32
    %c1_i32_3 = arith.constant 1 : i32
    %7 = arith.subi %3, %c1_i32_3 : i32
    %c0_i32_4 = arith.constant 0 : i32
    %8 = arith.maxsi %7, %c0_i32_4 : i32
    %c0_i32_5 = arith.constant 0 : i32
    %9 = arith.maxsi %c0_i32_5, %6 : i32
    %10 = arith.minsi %8, %9 : i32
    %11 = arith.addi %10, %5 : i32
    %c0_i32_6 = arith.constant 0 : i32
    %c0_i32_7 = arith.constant 0 : i32
    return %11, %c0_i32_6 : i32, i32
  }
  func.func @transform_2(%arg0: i32, %arg1: i32) -> (i32, i32) {
    %c0_i32 = arith.constant 0 : i32
    %0 = arith.muli %arg0, %c0_i32 : i32
    %c0_i32_0 = arith.constant 0 : i32
    %1 = arith.addi %c0_i32_0, %0 : i32
    %c-1_i32 = arith.constant -1 : i32
    %2 = arith.muli %arg0, %c-1_i32 : i32
    %c1_i32 = arith.constant 1 : i32
    %3 = arith.addi %c1_i32, %2 : i32
    %c1_i32_1 = arith.constant 1 : i32
    %4 = arith.muli %arg0, %c1_i32_1 : i32
    %c0_i32_2 = arith.constant 0 : i32
    %5 = arith.minsi %4, %c0_i32_2 : i32
    %6 = arith.subi %arg1, %1 : i32
    %c1_i32_3 = arith.constant 1 : i32
    %7 = arith.subi %3, %c1_i32_3 : i32
    %c0_i32_4 = arith.constant 0 : i32
    %8 = arith.maxsi %7, %c0_i32_4 : i32
    %c0_i32_5 = arith.constant 0 : i32
    %9 = arith.maxsi %c0_i32_5, %6 : i32
    %10 = arith.minsi %8, %9 : i32
    %11 = arith.addi %10, %5 : i32
    %c0_i32_6 = arith.constant 0 : i32
    %c0_i32_7 = arith.constant 0 : i32
    return %11, %c0_i32_6 : i32, i32
  }
  func.func @transform_3(%arg0: i32, %arg1: i32) -> (i32, i32) {
    %c0_i32 = arith.constant 0 : i32
    %0 = arith.muli %arg0, %c0_i32 : i32
    %c0_i32_0 = arith.constant 0 : i32
    %1 = arith.addi %c0_i32_0, %0 : i32
    %c-1_i32 = arith.constant -1 : i32
    %2 = arith.muli %arg0, %c-1_i32 : i32
    %c1_i32 = arith.constant 1 : i32
    %3 = arith.addi %c1_i32, %2 : i32
    %c1_i32_1 = arith.constant 1 : i32
    %4 = arith.muli %arg0, %c1_i32_1 : i32
    %c0_i32_2 = arith.constant 0 : i32
    %5 = arith.minsi %4, %c0_i32_2 : i32
    %6 = arith.subi %arg1, %1 : i32
    %c1_i32_3 = arith.constant 1 : i32
    %7 = arith.subi %3, %c1_i32_3 : i32
    %c0_i32_4 = arith.constant 0 : i32
    %8 = arith.maxsi %7, %c0_i32_4 : i32
    %c0_i32_5 = arith.constant 0 : i32
    %9 = arith.maxsi %c0_i32_5, %6 : i32
    %10 = arith.minsi %8, %9 : i32
    %11 = arith.addi %10, %5 : i32
    %c0_i32_6 = arith.constant 0 : i32
    %c0_i32_7 = arith.constant 0 : i32
    return %11, %c0_i32_6 : i32, i32
  }
  func.func @transform_4(%arg0: i32, %arg1: i32) -> (i32, i32) {
    %c-1_i32 = arith.constant -1 : i32
    %0 = arith.muli %arg0, %c-1_i32 : i32
    %c1_i32 = arith.constant 1 : i32
    %1 = arith.addi %c1_i32, %0 : i32
    %c1_i32_0 = arith.constant 1 : i32
    %2 = arith.muli %arg0, %c1_i32_0 : i32
    %c0_i32 = arith.constant 0 : i32
    %3 = arith.addi %c0_i32, %2 : i32
    %c0_i32_1 = arith.constant 0 : i32
    %4 = arith.muli %arg0, %c0_i32_1 : i32
    %c0_i32_2 = arith.constant 0 : i32
    %5 = arith.minsi %4, %c0_i32_2 : i32
    %6 = arith.subi %arg1, %1 : i32
    %c1_i32_3 = arith.constant 1 : i32
    %7 = arith.subi %3, %c1_i32_3 : i32
    %c0_i32_4 = arith.constant 0 : i32
    %8 = arith.maxsi %7, %c0_i32_4 : i32
    %c0_i32_5 = arith.constant 0 : i32
    %9 = arith.maxsi %c0_i32_5, %6 : i32
    %10 = arith.minsi %8, %9 : i32
    %11 = arith.addi %10, %5 : i32
    %c0_i32_6 = arith.constant 0 : i32
    %c0_i32_7 = arith.constant 0 : i32
    return %11, %c0_i32_6 : i32, i32
  }
  func.func @transform_5(%arg0: i32, %arg1: i32) -> (i32, i32) {
    %c-1_i32 = arith.constant -1 : i32
    %0 = arith.muli %arg0, %c-1_i32 : i32
    %c1_i32 = arith.constant 1 : i32
    %1 = arith.addi %c1_i32, %0 : i32
    %c1_i32_0 = arith.constant 1 : i32
    %2 = arith.muli %arg0, %c1_i32_0 : i32
    %c0_i32 = arith.constant 0 : i32
    %3 = arith.addi %c0_i32, %2 : i32
    %c0_i32_1 = arith.constant 0 : i32
    %4 = arith.muli %arg0, %c0_i32_1 : i32
    %c0_i32_2 = arith.constant 0 : i32
    %5 = arith.minsi %4, %c0_i32_2 : i32
    %6 = arith.subi %arg1, %1 : i32
    %c1_i32_3 = arith.constant 1 : i32
    %7 = arith.subi %3, %c1_i32_3 : i32
    %c0_i32_4 = arith.constant 0 : i32
    %8 = arith.maxsi %7, %c0_i32_4 : i32
    %c0_i32_5 = arith.constant 0 : i32
    %9 = arith.maxsi %c0_i32_5, %6 : i32
    %10 = arith.minsi %8, %9 : i32
    %11 = arith.addi %10, %5 : i32
    %c0_i32_6 = arith.constant 0 : i32
    %c0_i32_7 = arith.constant 0 : i32
    return %11, %c0_i32_6 : i32, i32
  }
  func.func @transform_6(%arg0: i32, %arg1: i32) -> (i32, i32) {
    %c-1_i32 = arith.constant -1 : i32
    %0 = arith.muli %arg0, %c-1_i32 : i32
    %c1_i32 = arith.constant 1 : i32
    %1 = arith.addi %c1_i32, %0 : i32
    %c1_i32_0 = arith.constant 1 : i32
    %2 = arith.muli %arg0, %c1_i32_0 : i32
    %c0_i32 = arith.constant 0 : i32
    %3 = arith.addi %c0_i32, %2 : i32
    %c0_i32_1 = arith.constant 0 : i32
    %4 = arith.muli %arg0, %c0_i32_1 : i32
    %c0_i32_2 = arith.constant 0 : i32
    %5 = arith.minsi %4, %c0_i32_2 : i32
    %6 = arith.subi %arg1, %1 : i32
    %c1_i32_3 = arith.constant 1 : i32
    %7 = arith.subi %3, %c1_i32_3 : i32
    %c0_i32_4 = arith.constant 0 : i32
    %8 = arith.maxsi %7, %c0_i32_4 : i32
    %c0_i32_5 = arith.constant 0 : i32
    %9 = arith.maxsi %c0_i32_5, %6 : i32
    %10 = arith.minsi %8, %9 : i32
    %11 = arith.addi %10, %5 : i32
    %c0_i32_6 = arith.constant 0 : i32
    %c0_i32_7 = arith.constant 0 : i32
    return %11, %c0_i32_6 : i32, i32
  }
  func.func @transform_7(%arg0: i32, %arg1: i32) -> (i32, i32) {
    %c-1_i32 = arith.constant -1 : i32
    %0 = arith.muli %arg0, %c-1_i32 : i32
    %c1_i32 = arith.constant 1 : i32
    %1 = arith.addi %c1_i32, %0 : i32
    %c1_i32_0 = arith.constant 1 : i32
    %2 = arith.muli %arg0, %c1_i32_0 : i32
    %c0_i32 = arith.constant 0 : i32
    %3 = arith.addi %c0_i32, %2 : i32
    %c0_i32_1 = arith.constant 0 : i32
    %4 = arith.muli %arg0, %c0_i32_1 : i32
    %c0_i32_2 = arith.constant 0 : i32
    %5 = arith.minsi %4, %c0_i32_2 : i32
    %6 = arith.subi %arg1, %1 : i32
    %c1_i32_3 = arith.constant 1 : i32
    %7 = arith.subi %3, %c1_i32_3 : i32
    %c0_i32_4 = arith.constant 0 : i32
    %8 = arith.maxsi %7, %c0_i32_4 : i32
    %c0_i32_5 = arith.constant 0 : i32
    %9 = arith.maxsi %c0_i32_5, %6 : i32
    %10 = arith.minsi %8, %9 : i32
    %11 = arith.addi %10, %5 : i32
    %c0_i32_6 = arith.constant 0 : i32
    %c0_i32_7 = arith.constant 0 : i32
    return %11, %c0_i32_6 : i32, i32
  }
  func.func @transform_8(%arg0: i32, %arg1: i32) -> (i32, i32) {
    %c0_i32 = arith.constant 0 : i32
    %0 = arith.muli %arg0, %c0_i32 : i32
    %c1_i32 = arith.constant 1 : i32
    %1 = arith.addi %c1_i32, %0 : i32
    %c-1_i32 = arith.constant -1 : i32
    %2 = arith.muli %arg0, %c-1_i32 : i32
    %c1_i32_0 = arith.constant 1 : i32
    %3 = arith.addi %c1_i32_0, %2 : i32
    %c1_i32_1 = arith.constant 1 : i32
    %4 = arith.muli %arg0, %c1_i32_1 : i32
    %c0_i32_2 = arith.constant 0 : i32
    %5 = arith.minsi %4, %c0_i32_2 : i32
    %6 = arith.subi %arg1, %1 : i32
    %c1_i32_3 = arith.constant 1 : i32
    %7 = arith.subi %3, %c1_i32_3 : i32
    %c0_i32_4 = arith.constant 0 : i32
    %8 = arith.maxsi %7, %c0_i32_4 : i32
    %c0_i32_5 = arith.constant 0 : i32
    %9 = arith.maxsi %c0_i32_5, %6 : i32
    %10 = arith.minsi %8, %9 : i32
    %11 = arith.addi %10, %5 : i32
    %c0_i32_6 = arith.constant 0 : i32
    %c0_i32_7 = arith.constant 0 : i32
    return %11, %c0_i32_6 : i32, i32
  }
  func.func @transform_9(%arg0: i32, %arg1: i32) -> (i32, i32) {
    %c0_i32 = arith.constant 0 : i32
    %0 = arith.muli %arg0, %c0_i32 : i32
    %c1_i32 = arith.constant 1 : i32
    %1 = arith.addi %c1_i32, %0 : i32
    %c-1_i32 = arith.constant -1 : i32
    %2 = arith.muli %arg0, %c-1_i32 : i32
    %c1_i32_0 = arith.constant 1 : i32
    %3 = arith.addi %c1_i32_0, %2 : i32
    %c1_i32_1 = arith.constant 1 : i32
    %4 = arith.muli %arg0, %c1_i32_1 : i32
    %c0_i32_2 = arith.constant 0 : i32
    %5 = arith.minsi %4, %c0_i32_2 : i32
    %6 = arith.subi %arg1, %1 : i32
    %c1_i32_3 = arith.constant 1 : i32
    %7 = arith.subi %3, %c1_i32_3 : i32
    %c0_i32_4 = arith.constant 0 : i32
    %8 = arith.maxsi %7, %c0_i32_4 : i32
    %c0_i32_5 = arith.constant 0 : i32
    %9 = arith.maxsi %c0_i32_5, %6 : i32
    %10 = arith.minsi %8, %9 : i32
    %11 = arith.addi %10, %5 : i32
    %c0_i32_6 = arith.constant 0 : i32
    %c0_i32_7 = arith.constant 0 : i32
    return %11, %c0_i32_6 : i32, i32
  }
  func.func @transform_10(%arg0: i32, %arg1: i32) -> (i32, i32) {
    %c0_i32 = arith.constant 0 : i32
    %0 = arith.muli %arg0, %c0_i32 : i32
    %c1_i32 = arith.constant 1 : i32
    %1 = arith.addi %c1_i32, %0 : i32
    %c-1_i32 = arith.constant -1 : i32
    %2 = arith.muli %arg0, %c-1_i32 : i32
    %c1_i32_0 = arith.constant 1 : i32
    %3 = arith.addi %c1_i32_0, %2 : i32
    %c1_i32_1 = arith.constant 1 : i32
    %4 = arith.muli %arg0, %c1_i32_1 : i32
    %c0_i32_2 = arith.constant 0 : i32
    %5 = arith.minsi %4, %c0_i32_2 : i32
    %6 = arith.subi %arg1, %1 : i32
    %c1_i32_3 = arith.constant 1 : i32
    %7 = arith.subi %3, %c1_i32_3 : i32
    %c0_i32_4 = arith.constant 0 : i32
    %8 = arith.maxsi %7, %c0_i32_4 : i32
    %c0_i32_5 = arith.constant 0 : i32
    %9 = arith.maxsi %c0_i32_5, %6 : i32
    %10 = arith.minsi %8, %9 : i32
    %11 = arith.addi %10, %5 : i32
    %c0_i32_6 = arith.constant 0 : i32
    %c0_i32_7 = arith.constant 0 : i32
    return %11, %c0_i32_6 : i32, i32
  }
  func.func @transform_11(%arg0: i32, %arg1: i32) -> (i32, i32) {
    %c0_i32 = arith.constant 0 : i32
    %0 = arith.muli %arg0, %c0_i32 : i32
    %c1_i32 = arith.constant 1 : i32
    %1 = arith.addi %c1_i32, %0 : i32
    %c-1_i32 = arith.constant -1 : i32
    %2 = arith.muli %arg0, %c-1_i32 : i32
    %c1_i32_0 = arith.constant 1 : i32
    %3 = arith.addi %c1_i32_0, %2 : i32
    %c1_i32_1 = arith.constant 1 : i32
    %4 = arith.muli %arg0, %c1_i32_1 : i32
    %c0_i32_2 = arith.constant 0 : i32
    %5 = arith.minsi %4, %c0_i32_2 : i32
    %6 = arith.subi %arg1, %1 : i32
    %c1_i32_3 = arith.constant 1 : i32
    %7 = arith.subi %3, %c1_i32_3 : i32
    %c0_i32_4 = arith.constant 0 : i32
    %8 = arith.maxsi %7, %c0_i32_4 : i32
    %c0_i32_5 = arith.constant 0 : i32
    %9 = arith.maxsi %c0_i32_5, %6 : i32
    %10 = arith.minsi %8, %9 : i32
    %11 = arith.addi %10, %5 : i32
    %c0_i32_6 = arith.constant 0 : i32
    %c0_i32_7 = arith.constant 0 : i32
    return %11, %c0_i32_6 : i32, i32
  }
  func.func @transform_12(%arg0: i32, %arg1: i32) -> (i32, i32, i32) {
    %c0_i32 = arith.constant 0 : i32
    %c0_i32_0 = arith.constant 0 : i32
    %c0_i32_1 = arith.constant 0 : i32
    return %arg0, %c0_i32, %c0_i32_0 : i32, i32, i32
  }
}

</mosaic_0001>

<bundles_post_ra>
// kernel: flow_teacher_loss.1
= control target key start
LH: loop header
LB: loop body
LE: loop exit
PB: predicated region body
PF: predicated region fallthrough
CT: control target
= control target key end

     0   :  { %s2114_s21 = smov 0   ;;  %s2116_s22 = smov 0   ;;  %s2276_s0 = inlined_call_operand.vmem [shape: f32[2,512], index: 0, kind: input, shape index: {}]   ;;  %s2277_s1 = inlined_call_operand.vmem [shape: f32[2,512], index: 1, kind: input, shape index: {}]   ;;  %s2278_s2 = inlined_call_operand.vmem [shape: f32[2,512], index: 2, kind: input, shape index: {}]   ;;  %s2279_s3 = inlined_call_operand.vmem [shape: f32[2,512], index: 3, kind: input, shape index: {}]   ;;  %s2280_s4 = inlined_call_operand.vmem [shape: f32[1,256], index: 4, kind: input, shape index: {}]   ;;  %s2281_s5 = inlined_call_operand.vmem [shape: f32[1,256], index: 5, kind: input, shape index: {}]   ;;  %s2282_s6 = inlined_call_operand.vmem [shape: f32[1,256], index: 6, kind: input, shape index: {}]   ;;  %s2283_s7 = inlined_call_operand.vmem [shape: f32[1,256], index: 7, kind: input, shape index: {}]   ;;  %s2284_s8 = inlined_call_operand.vmem [shape: f32[1,128], index: 8, kind: input, shape index: {}]   ;;  %s2285_s9 = inlined_call_operand.vmem [shape: f32[1,128], index: 9, kind: input, shape index: {}]   ;;  %s2286_s10 = inlined_call_operand.vmem [shape: f32[1,128], index: 10, kind: input, shape index: {}]   ;;  %s2287_s11 = inlined_call_operand.vmem [shape: f32[1,128], index: 11, kind: input, shape index: {}]   ;;  %s2288_s12 = inlined_call_operand.vmem [shape: f32[2,8,128], index: 12, kind: output, shape index: {}]  }
   0x1   :  { %2292 = sst [smem:[#allocation10_spill]] %s2280_s4  ;;  %s2118_s23 = smov 0  }
   0x2   :  { %2293 = sst [smem:[#allocation11_spill]] %s2282_s6  ;;  %s2120_s24 = smov 0  }
   0x3   :  { %2294 = sst [smem:[#allocation12_spill]] %s2283_s7  ;;  %s2122_s25 = smov 0  }
   0x4 LB: > { %2295 = sst [smem:[#allocation5_spill]] %s2037_s23  ;;  %s31_s26 = sadd.s32 1, %s2037_s23  ;;  %s2045_s25 = sphi %s2122_s25, %s22_s25   ;;  %s2041_s24 = sphi %s2120_s24, %s2312_s24   ;;  %s2037_s23 = sphi %s2118_s23, %s2311_s23   ;;  %s2033_s22 = sphi %s2116_s22, %s2310_s22   ;;  %s2029_s21 = sphi %s2114_s21, %s2309_s21  }
   0x5   : > { %2296 = sst [smem:[#allocation6_spill]] %s2041_s24  ;;  %s34_s27 = sadd.s32 1, %s2041_s24 }
   0x6   : > { %2297 = sst [smem:[#allocation7_spill]] %s2045_s25  ;;  %p32_p0 = scmp.ge.s32.totalorder %s31_s26, 2 }
   0x7   : > { %p1911_p1 = scmp.ge.s32.totalorder %s2045_s25, 1  ;;  %p952_p2 = scmp.lt.s32.totalorder %s2045_s25, 5 }
   0x8   : > { %s2314_s26 = smov (%p32_p0, %s31_s26), 0  ;;  %s2316_s27 = smov (!%p32_p0, %s34_s27), %s2041_s24 }
   0x9   : > { %2298 = sst [smem:[#allocation8_spill]] %s2314_s26  ;;  %p953_p3 = pnand %p1911_p1, %p952_p2 }
   0xa   : > { %p36_p4 = scmp.ge.s32.totalorder %s2316_s27, 2  ;;  %s1156_s28 = smul.u32 (!%p953_p3), 4294967295, %s2033_s22 }
   0xb   : > { %956 = sbr.rel (%p953_p3) target bundleno = 450 (0x1c2), region = 68  ;;  %p1157_p5 = scmp.lt.s32.totalorder (!%p953_p3), %s2033_s22, 0 }
   0xc   : > { %s2318_s27 = smov (%p36_p4, %s2316_s27), 0  ;;  %p1161_p6 = scmp.gt.s32.totalorder (!%p953_p3), %s2029_s21, 0 }
   0xd   : > { %2299 = sst [smem:[#allocation9_spill]] %s2318_s27  ;;  %p1159_p7 = scmp.gt.s32.totalorder (!%p953_p3), %s1156_s28, 0 }
   0xe   : > { %s2155_s16 = sadd.s32 (!%p953_p3), 4294967295, %s2029_s21  ;;  %p1444_p11 = scmp.lt.s32.totalorder (!%p953_p3), %s2033_s22, 1 }
   0xf   : > { %p1350_p10 = scmp.gt.s32.totalorder (!%p953_p3), %s2155_s16, 0  ;;  %p1933_p0 = scmp.ne.s32.totalorder (!%p953_p3), %s2029_s21, 0 }
  0x10   : > { %s1158_s30 = scalar_select %p1157_p5, %s2033_s22, 0 }
  0x11   : > { %s1162_s13 = scalar_select %p1161_p6, %s2029_s21, 0 }
  0x12   : > { %s2320_s28 = smov (!%p1159_p7, %s1156_s28), 0 }
  0x13   : > { %p1163_p8 = scmp.lt.s32.totalorder %s2320_s28, %s1162_s13 }
  0x14   : > { %s1351_s6 = scalar_select %p1350_p10, %s2155_s16, 0 }
  0x15   : > { %s1164_s14 = scalar_select %p1163_p8, %s2320_s28, %s1162_s13 }
  0x16   : > { %p1352_p12 = scmp.lt.s32.totalorder %s2320_s28, %s1351_s6 }
  0x17   : > { %s1165_s15 = sadd.s32 %s1164_s14, %s1158_s30 }
  0x18   : > { %p1166_p9 = scmp.lt.s32.totalorder %s1165_s15, 0  ;;  %s2324_s28 = smov (!%p1352_p12, %s2320_s28), %s1351_s6 }
  0x19   : > { %s1445_s4 = scalar_select %p1444_p11, %s2033_s22, 1 }
  0x1a   : > { %s2322_s15 = smov (!%p1166_p9, %s1165_s15), 0  ;;  %s1354_s18 = sadd.s32 %s2324_s28, %s1158_s30 }
  0x1b   : > { %s2157_s17 = sshll.u32 %s2322_s15, 3  ;;  %s1932_s7 = sshll.u32 %s1445_s4, 3 }
  0x1c   : > { %s1195_s14 = scalar_lea.vmem %s2277_s1, %s2157_s17  ;;  %s1245_s25 = scalar_lea.vmem %s2279_s3, %s2157_s17 }
  0x1d   : > { %s2182_s29 = scalar_lea.vmem %s2288_s12, %s1932_s7  ;;  %p1355_p13 = scmp.lt.s32.totalorder %s1354_s18, 0 }
  0x1e   : > { %1451 = sbr.rel (%p1933_p0) target bundleno = 39 (0x27), region = 72 }
  0x1f   : > { %s2326_s18 = smov (!%p1355_p13, %s1354_s18), 0 }
  0x20   : > { %s2187_s13 = scalar_lea.vmem %s2284_s8, %s2326_s18  ;;  %s2192_s24 = scalar_lea.vmem %s2285_s9, %s2326_s18 }
  0x21   : > { %s2197_s28 = scalar_lea.vmem %s2286_s10, %s2326_s18  ;;  %s2202_s20 = scalar_lea.vmem %s2287_s11, %s2326_s18 }
  0x23   : > { %v1453_v0 = vlaneseq  ;;  %v2047_v1 = vmov 0.0  }
  0x24   : > { %1452 = vst [vmem:[#allocation2] sm:$0xff] %v2047_v1  ;;  %1458 = vst [vmem:[#allocation4] sm:$0x1] %v2047_v1 }
  0x25   : > { %vm1455_vm0 = vcmp.lt.s32.totalorder %v1453_v0, 256 }
  0x26   : > { %1457 = vst.msk [vmem:[#allocation3] sm:$0x3] %vm1455_vm0, %v2047_v1 }
  0x27 PF: > { %p1460_p1 = scmp.ge.s32.totalorder %s2029_s21, 0  ;;  %s2300_s19 = ssub.s32 1, %s2033_s22 }
  0x28   : > { %p1461_p2 = scmp.lt.s32.totalorder %s2029_s21, %s2300_s19 }
  0x2a   : > { %p1462_p3 = pnand %p1461_p2, %p1460_p1 }
  0x2b   : > { %s2301_s27 = scalar_lea.vmem (!%p1462_p3), %s2276_s0, %s2157_s17  ;;  %s2302_s6 = scalar_lea.vmem (!%p1462_p3), %s2278_s2, %s2157_s17 }
  0x2c   : > { %1465 = sbr.rel (%p1462_p3) target bundleno = 82 (0x52), region = 76 }
  0x31   : > { %v1466_v2 = vld [vmem:[%s1195_s14] sm:$0xff] }
  0x32   : > { %v1467_v3 = vld [vmem:[%s1245_s25] sm:$0xff] }
  0x33   : > { %v1468_v4 = vld [vmem:[%s2301_s27] sm:$0xff] }
  0x34   : > { %v1469_v5 = vsub.f32 %v1468_v4, %v1466_v2  ;;  %v1470_v6 = vld [vmem:[%s2302_s6] sm:$0xff] }
  0x35   : > { %v1471_v7 = vsub.f32 %v1470_v6, %v1467_v3  ;;  %v1491_v22 = vld [vmem:[#allocation2] sm:$0xff] }
  0x36   : > { %v1472_v8 = vmul.f32 %v1469_v5, %v1469_v5 }
  0x37   : > { %v1481_v9 = vmul.f32 %v1471_v7, %v1471_v7 }
  0x38   : > { %v1473_v10 = vadd.f32 1e-12, %v1472_v8 }
  0x39   : > { %v1482_v11 = vadd.f32 1e-12, %v1481_v9 }
  0x3a   : > { %1990 = vrsqrt.f32 %v1473_v10  ;;  %vm1476_vm1 = vcmp.eq.f32.partialorder %v1473_v10, inf  ;;  %v1479_v13 = vand.u32 2147483648, %v1473_v10  ;;  %vm1478_vm2 = vcmp.eq.f32.partialorder %v1473_v10, 0.0 }
  0x3b   : > { %1992 = vrsqrt.f32 %v1482_v11  ;;  %vm1485_vm3 = vcmp.eq.f32.partialorder %v1482_v11, inf  ;;  %v1488_v16 = vand.u32 2147483648, %v1482_v11  ;;  %vm1487_vm4 = vcmp.eq.f32.partialorder %v1482_v11, 0.0 }
  0x47   : > { %v1991_v12 = vpop.eup %1990 }
  0x48   : > { %v1993_v14 = vpop.eup %1992  ;;  %v1475_v15 = vmul.f32 %v1991_v12, %v1473_v10 }
  0x49   : > { %v1484_v17 = vmul.f32 %v1993_v14, %v1482_v11 }
  0x4a   : > { %v1477_v18 = vsel %vm1476_vm1, %v1473_v10, %v1475_v15 }
  0x4b   : > { %v1480_v19 = vsel %vm1478_vm2, %v1479_v13, %v1477_v18  ;;  %v1486_v20 = vsel %vm1485_vm3, %v1482_v11, %v1484_v17 }
  0x4c   : > { %v1489_v21 = vsel %vm1487_vm4, %v1488_v16, %v1486_v20 }
  0x4d   : > { %v1490_v23 = vadd.f32 %v1489_v21, %v1480_v19 }
  0x4f   : > { %v1492_v24 = vadd.f32 %v1491_v22, %v1490_v23 }
  0x51   : > { %1493 = vst [vmem:[#allocation2] sm:$0xff] %v1492_v24 }
  0x52 PF: > { %s2303_s25 = ssub.s32 1, %s2033_s22  ;;  %p1495_p5 = scmp.lt.s32.totalorder %s2029_s21, 1 }
  0x53   : > { %p1494_p4 = scmp.ge.s32.totalorder %s2029_s21, %s2303_s25 }
  0x55   : > { %p1496_p6 = pnand %p1495_p5, %p1494_p4 }
  0x56   : > { %s2304_s7 = sld [smem:[#allocation12_spill]] (!%p1496_p6) }
  0x57   : > { %1499 = sbr.rel (%p1496_p6) target bundleno = 125 (0x7d), region = 80  ;;  %s2305_s26 = sld [smem:[#allocation10_spill]] (!%p1496_p6) }
  0x58   : > { %s2306_s15 = sld [smem:[#allocation11_spill]] (!%p1496_p6) }
  0x5c   : > { %v1500_v25 = vld [vmem:[%s2281_s5] sm:$0x3]  ;;  %v1529_v44 = vlaneseq  ;;  %v1527_v48 = vld [vmem:[#allocation3] sm:$0x3] }
  0x5d   : > { %v1501_v26 = vld [vmem:[%s2304_s7] sm:$0x3]  ;;  %v1502_v28 = vmul.f32 0.5, %v1500_v25 }
  0x5e   : > { %v1504_v27 = vld [vmem:[%s2305_s26] sm:$0x3]  ;;  %v1503_v29 = vmul.f32 0.5, %v1501_v26  ;;  %vm1531_vm9 = vcmp.lt.s32.totalorder %v1529_v44, 256 }
  0x5f   : > { %v1506_v30 = vld [vmem:[%s2306_s15] sm:$0x3]  ;;  %v1505_v31 = vsub.f32 %v1504_v27, %v1502_v28 }
  0x60   : > { %v1507_v32 = vsub.f32 %v1506_v30, %v1503_v29 }
  0x61   : > { %v1508_v33 = vmul.f32 %v1505_v31, %v1505_v31 }
  0x62   : > { %v1517_v34 = vmul.f32 %v1507_v32, %v1507_v32 }
  0x63   : > { %v1509_v35 = vadd.f32 1e-12, %v1508_v33 }
  0x64   : > { %v1518_v36 = vadd.f32 1e-12, %v1517_v34 }
  0x65   : > { %1994 = vrsqrt.f32 %v1509_v35  ;;  %vm1512_vm5 = vcmp.eq.f32.partialorder %v1509_v35, inf  ;;  %v1515_v38 = vand.u32 2147483648, %v1509_v35  ;;  %vm1514_vm6 = vcmp.eq.f32.partialorder %v1509_v35, 0.0 }
  0x66   : > { %1996 = vrsqrt.f32 %v1518_v36  ;;  %vm1521_vm7 = vcmp.eq.f32.partialorder %v1518_v36, inf  ;;  %v1524_v41 = vand.u32 2147483648, %v1518_v36  ;;  %vm1523_vm8 = vcmp.eq.f32.partialorder %v1518_v36, 0.0 }
  0x72   : > { %v1995_v37 = vpop.eup %1994 }
  0x73   : > { %v1997_v39 = vpop.eup %1996  ;;  %v1511_v40 = vmul.f32 %v1995_v37, %v1509_v35 }
  0x74   : > { %v1520_v42 = vmul.f32 %v1997_v39, %v1518_v36 }
  0x75   : > { %v1513_v43 = vsel %vm1512_vm5, %v1509_v35, %v1511_v40 }
  0x76   : > { %v1516_v45 = vsel %vm1514_vm6, %v1515_v38, %v1513_v43  ;;  %v1522_v46 = vsel %vm1521_vm7, %v1518_v36, %v1520_v42 }
  0x77   : > { %v1525_v47 = vsel %vm1523_vm8, %v1524_v41, %v1522_v46 }
  0x78   : > { %v1526_v49 = vadd.f32 %v1525_v47, %v1516_v45 }
  0x7a   : > { %v1528_v50 = vadd.f32 %v1527_v48, %v1526_v49 }
  0x7c   : > { %1533 = vst.msk [vmem:[#allocation3] sm:$0x3] %vm1531_vm9, %v1528_v50 }
  0x7d PF: > { %p1534_p7 = scmp.ge.s32.totalorder %s2029_s21, 1  ;;  %s1535_s6 = ssub.s32 2, %s2033_s22 }
  0x7e   : > { %p1536_p8 = scmp.lt.s32.totalorder %s2029_s21, %s1535_s6  ;;  %s1540_s25 = sadd.s32 %s2033_s22, %s2155_s16 }
  0x7f   : > { %p1541_p10 = scmp.eq.s32.totalorder %s1540_s25, 0 }
  0x80   : > { %p1537_p9 = pnand %p1536_p8, %p1534_p7 }
  0x82   : > { %p1538_p11 = pneg %p1537_p9 }
  0x84   : > { %p2240_p12 = pnand %p1541_p10, %p1538_p11 }
  0x86   : > { %p1545_p13 = pnand %p2240_p12, %p1538_p11 }
  0x88   : > { %1548 = sbr.rel (%p1545_p13) target bundleno = 174 (0xae), region = 84 }
  0x8d   : > { %v1549_v51 = vld [vmem:[%s2192_s24] sm:$0x1]  ;;  %v1576_v9 = vld [vmem:[#allocation4] sm:$0x1] }
  0x8e   : > { %v1550_v52 = vld [vmem:[%s2202_s20] sm:$0x1]  ;;  %v1551_v54 = vmul.f32 0.25, %v1549_v51 }
  0x8f   : > { %v1553_v53 = vld [vmem:[%s2187_s13] sm:$0x1]  ;;  %v1552_v55 = vmul.f32 0.25, %v1550_v52 }
  0x90   : > { %v1555_v56 = vld [vmem:[%s2197_s28] sm:$0x1]  ;;  %v1554_v57 = vsub.f32 %v1553_v53, %v1551_v54 }
  0x91   : > { %v1556_v58 = vsub.f32 %v1555_v56, %v1552_v55 }
  0x92   : > { %v1557_v59 = vmul.f32 %v1554_v57, %v1554_v57 }
  0x93   : > { %v1566_v60 = vmul.f32 %v1556_v58, %v1556_v58 }
  0x94   : > { %v1558_v61 = vadd.f32 1e-12, %v1557_v59 }
  0x95   : > { %v1567_v62 = vadd.f32 1e-12, %v1566_v60 }
  0x96   : > { %1998 = vrsqrt.f32 %v1558_v61  ;;  %vm1561_vm10 = vcmp.eq.f32.partialorder %v1558_v61, inf  ;;  %v1564_v0 = vand.u32 2147483648, %v1558_v61  ;;  %vm1563_vm11 = vcmp.eq.f32.partialorder %v1558_v61, 0.0 }
  0x97   : > { %2000 = vrsqrt.f32 %v1567_v62  ;;  %vm1570_vm12 = vcmp.eq.f32.partialorder %v1567_v62, inf  ;;  %v1573_v3 = vand.u32 2147483648, %v1567_v62  ;;  %vm1572_vm13 = vcmp.eq.f32.partialorder %v1567_v62, 0.0 }
  0xa3   : > { %v1999_v63 = vpop.eup %1998 }
  0xa4   : > { %v2001_v1 = vpop.eup %2000  ;;  %v1560_v2 = vmul.f32 %v1999_v63, %v1558_v61 }
  0xa5   : > { %v1569_v4 = vmul.f32 %v2001_v1, %v1567_v62 }
  0xa6   : > { %v1562_v5 = vsel %vm1561_vm10, %v1558_v61, %v1560_v2 }
  0xa7   : > { %v1565_v6 = vsel %vm1563_vm11, %v1564_v0, %v1562_v5  ;;  %v1571_v7 = vsel %vm1570_vm12, %v1567_v62, %v1569_v4 }
  0xa8   : > { %v1574_v8 = vsel %vm1572_vm13, %v1573_v3, %v1571_v7 }
  0xa9   : > { %v1575_v10 = vadd.f32 %v1574_v8, %v1565_v6 }
  0xab   : > { %v1577_v11 = vadd.f32 %v1576_v9, %v1575_v10 }
  0xad   : > { %1578 = vst [vmem:[#allocation4] sm:$0x1] %v1577_v11 }
  0xae PF: > { %1580 = sbr.rel (%p2240_p12) target bundleno = 213 (0xd5), region = 88 }
  0xb3   : > { %v1581_v12 = vld [vmem:[%s2192_s24] sm:$0x1]  ;;  %v1608_v24 = vlaneseq }
  0xb4   : > { %v1582_v13 = vld [vmem:[%s2202_s20] sm:$0x1]  ;;  %v1583_v15 = vmul.f32 0.25, %v1581_v12  ;;  %v1616_v40 = vld [vmem:[#allocation4] sm:$0x1] }
  0xb5   : > { %v1585_v14 = vld [vmem:[%s2187_s13] sm:$0x1]  ;;  %v1584_v16 = vmul.f32 0.25, %v1582_v13  ;;  %v1609_v25 = vshrl.u32 %v1608_v24, 7  ;;  %v1611_v26 = vand.u32 127, %v1608_v24 }
  0xb6   : > { %v1587_v17 = vld [vmem:[%s2197_s28] sm:$0x1]  ;;  %v1586_v18 = vsub.f32 %v1585_v14, %v1583_v15 }
  0xb7   : > { %v1588_v19 = vsub.f32 %v1587_v17, %v1584_v16  ;;  %v1612_v27 = vmul.u32 128, %v1609_v25 }
  0xb8   : > { %v1589_v20 = vmul.f32 %v1586_v18, %v1586_v18 }
  0xb9   : > { %v1598_v21 = vmul.f32 %v1588_v19, %v1588_v19  ;;  %v1613_v30 = vadd.s32 %v1612_v27, %v1611_v26 }
  0xba   : > { %v1590_v22 = vadd.f32 1e-12, %v1589_v20 }
  0xbb   : > { %v1599_v23 = vadd.f32 1e-12, %v1598_v21  ;;  %vm1614_vm2 = vcmp.lt.s32.totalorder %v1613_v30, 64 }
  0xbc   : > { %2002 = vrsqrt.f32 %v1590_v22  ;;  %vm1593_vm14 = vcmp.eq.f32.partialorder %v1590_v22, inf  ;;  %v1596_v29 = vand.u32 2147483648, %v1590_v22  ;;  %vm1595_vm15 = vcmp.eq.f32.partialorder %v1590_v22, 0.0 }
  0xbd   : > { %2004 = vrsqrt.f32 %v1599_v23  ;;  %vm1602_vm0 = vcmp.eq.f32.partialorder %v1599_v23, inf  ;;  %v1605_v33 = vand.u32 2147483648, %v1599_v23  ;;  %vm1604_vm1 = vcmp.eq.f32.partialorder %v1599_v23, 0.0 }
  0xc9   : > { %v2003_v28 = vpop.eup %2002 }
  0xca   : > { %v2005_v31 = vpop.eup %2004  ;;  %v1592_v32 = vmul.f32 %v2003_v28, %v1590_v22 }
  0xcb   : > { %v1601_v34 = vmul.f32 %v2005_v31, %v1599_v23 }
  0xcc   : > { %v1594_v35 = vsel %vm1593_vm14, %v1590_v22, %v1592_v32 }
  0xcd   : > { %v1597_v36 = vsel %vm1595_vm15, %v1596_v29, %v1594_v35  ;;  %v1603_v37 = vsel %vm1602_vm0, %v1599_v23, %v1601_v34 }
  0xce   : > { %v1606_v38 = vsel %vm1604_vm1, %v1605_v33, %v1603_v37 }
  0xcf   : > { %v1607_v39 = vadd.f32 %v1606_v38, %v1597_v36 }
  0xd1   : > { %v1615_v41 = vsel %vm1614_vm2, %v1607_v39, 0.0 }
  0xd2   : > { %v1617_v42 = vadd.f32 %v1616_v40, %v1615_v41 }
  0xd4   : > { %1618 = vst [vmem:[#allocation4] sm:$0x1] %v1617_v42 }
  0xd5 PF: > { %p1935_p0 = scmp.ne.s32.totalorder %s2029_s21, 1 }
  0xd7   : > { %1622 = sbr.rel (%p1935_p0) target bundleno = 450 (0x1c2), region = 92 }
  0xdc   : > { %vm1677_vm3 = vcmask 1040384   ;;  %v1692_v43 = vld [vmem:[#allocation4] sm:$0x1]  ;;  %v1629_v44 = vlaneseq  ;;  %v2048_v46 = vmov 1983009808   ;;  %v1623_v48 = vld [vmem:[#allocation2] sm:$0xff] }
  0xdd   : > { %v1693_v45 = vsel %vm1677_vm3, %v1692_v43, 0.0  ;;  %v1627_v47 = vunpack.c.l.s4 %v2048_v46  ;;  %v1625_v50 = vcombine.high %v1623_v48, %v1623_v48  ;;  %vm1646_vm4 = vcmask 1041408   ;;  %v1665_v57 = vld [vmem:[#allocation3] sm:$0x3] }
  0xde   : > { %1694 = vadd.xlane.f32.xlu1 %v1693_v45  ;;  %v1630_v49 = vshrl.u32 %v1629_v44, 7 }
  0xdf   : > { %v1628_v51 = vunpack.c.0.s8 %v1627_v47 }
  0xe0   : > { %v1669_v55 = vsub.s32 0, %v1630_v49  ;;  %v1673_v56 = vsub.s32 1, %v1630_v49 }
  0xe1   : > { %v1631_v52 = vsub.s32 %v1628_v51, %v1630_v49 }
  0xe2   : > { %v1670_v63 = vrot.slane %v1665_v57, %v1669_v55  ;;  %v1674_v0 = vrot.slane %v1665_v57, %v1673_v56 }
  0xe3   : > { %v1632_v53 = vrot.slane %v1623_v48, %v1631_v52  ;;  %v1639_v54 = vrot.slane %v1625_v50, %v1631_v52 }
  0xe4   : > { %v1678_v4 = vsel %vm1677_vm3, %v1670_v63, 0.0  ;;  %v1679_v5 = vsel %vm1677_vm3, %v1674_v0, 0.0 }
  0xe5   : > { %v1640_v58 = vcombine.high %v1632_v53, %v1632_v53  ;;  %v1641_v59 = vcombine.high %v1639_v54, %v1639_v54  ;;  %v1647_v60 = vsel %vm1646_vm4, %v1632_v53, 0.0  ;;  %v1650_v62 = vsel %vm1646_vm4, %v1639_v54, 0.0 }
  0xe6   : > { %v1680_v7 = vadd.f32 %v1679_v5, %v1678_v4 }
  0xe7   : > { %v1648_v61 = vsel %vm1646_vm4, %v1640_v58, 0.0  ;;  %v1652_v2 = vsel %vm1646_vm4, %v1641_v59, 0.0 }
  0xe8   : > { %v1649_v1 = vadd.f32 %v1648_v61, %v1647_v60 }
  0xea   : > { %v1651_v3 = vadd.f32 %v1650_v62, %v1649_v1 }
  0xec   : > { %v1653_v6 = vadd.f32 %v1652_v2, %v1651_v3 }
  0xee   : > { %1654 = vadd.xlane.f32.xlu0 %v1653_v6 }
  0xf2   : > { %1681 = vadd.xlane.f32.xlu0 %v1680_v7 }
 0x167   : > { %v1695_v8 = vpop.xlane.xlu1 %1694 }
 0x168   : > { %v1696_v9 = vrot.slane %v1695_v8, 4 }
 0x16a   : > { %v1697_v10 = vadd.f32 %v1696_v9, %v1695_v8 }
 0x16c   : > { %v1698_v14 = vrot.slane %v1697_v10, 2 }
 0x16e   : > { %v1699_v20 = vadd.f32 %v1698_v14, %v1697_v10 }
 0x170   : > { %v1700_v25 = vrot.slane %v1699_v20, 1 }
 0x172   : > { %v1701_v28 = vadd.f32 %v1700_v25, %v1699_v20 }
 0x177   : > { %v1655_v11 = vpop.xlane.xlu0 %1654 }
 0x178   : > { %v1656_v12 = vrot.slane %v1655_v11, 4 }
 0x17a   : > { %v1657_v13 = vadd.f32 %v1656_v12, %v1655_v11 }
 0x17b   : > { %v1682_v15 = vpop.xlane.xlu0 %1681 }
 0x17c   : > { %v1658_v16 = vrot.slane %v1657_v13, 2  ;;  %v1683_v17 = vrot.slane %v1682_v15, 4 }
 0x17e   : > { %v1684_v18 = vadd.f32 %v1683_v17, %v1682_v15  ;;  %v1659_v19 = vadd.f32 %v1658_v16, %v1657_v13 }
 0x180   : > { %v1685_v21 = vrot.slane %v1684_v18, 2  ;;  %v1660_v22 = vrot.slane %v1659_v19, 1 }
 0x182   : > { %v1686_v23 = vadd.f32 %v1685_v21, %v1684_v18  ;;  %v1661_v24 = vadd.f32 %v1660_v22, %v1659_v19 }
 0x184   : > { %1942 = vpush %v1661_v24  ;;  %v1687_v26 = vrot.slane %v1686_v23, 1 }
 0x186   : > { %v1688_v27 = vadd.f32 %v1687_v26, %v1686_v23 }
 0x188   : > { %1944 = vpush %v1688_v27 }
 0x189   : > { %1946 = vpush %v1701_v28 }
 0x1b5   : > { %s1943_s21 = spop %1942 }
 0x1b6   : > { %s1663_s22 = smul.f32 0.0009765625, %s1943_s21 }
 0x1b9   : > { %s1945_s24 = spop %1944 }
 0x1ba   : > { %s1690_s16 = smul.f32 0.003125, %s1945_s24  ;;  %s1947_s13 = spop %1946 }
 0x1bb   : > { %s1703_s20 = smul.f32 0.01, %s1947_s13 }
 0x1bc   : > { %s1691_s28 = sadd.f32 %s1690_s16, %s1663_s22 }
 0x1be   : > { %s1704_s14 = sadd.f32 %s1703_s20, %s1691_s28 }
 0x1c0   : > { %v1705_v29 = vstv %s1704_s14 }
 0x1c1   : > { %1706 = vst [vmem:[%s2182_s29] sm:$0xff] %v1705_v29 }
 0x1c2 PF: > { %s2308_s4 = sld [smem:[#allocation7_spill]] }
 0x1c3   : > { %s2309_s21 = sld [smem:[#allocation5_spill]] }
 0x1c4   : > { %s2310_s22 = sld [smem:[#allocation6_spill]] }
 0x1c5   : > { %s2311_s23 = sld [smem:[#allocation8_spill]] }
 0x1c6   : > { %s2312_s24 = sld [smem:[#allocation9_spill]] }
 0x1c8   : > { %s22_s25 = sadd.s32 1, %s2308_s4  }
 0x1c9   : > { %p19_p1 = scmp.ge.s32.totalorder %s22_s25, 6  }
 0x1cb   :  { %21 = sbr.rel (!%p19_p1) target bundleno = 4 (0x4), region = 155 }

</bundles_post_ra>
